<compile_context>
chip_gen: v7x
topology: tpu7x:2x2x1
jax: 0.10.0
libtpu: 0.0.40
codegen_flags: <defaults>
</compile_context>

<pallas_src>
import functools
from typing import NamedTuple, Optional

import jax
import jax.numpy as jnp
from jax import lax
from jax.experimental import pallas as pl
from jax.experimental.pallas import tpu as pltpu


def _round_up(a: int, m: int) -> int:
    return (a + m - 1) // m * m


def _device_vmem_bytes() -> int:
    try:
        return int(pltpu.get_tpu_info().vmem_capacity_bytes)
    except Exception:
        return 128 << 20  # conservative default (v5e/v6e physical)


# ---------------------------------------------------------------------------
# Kernel bodies
# ---------------------------------------------------------------------------

def _routing_select_and_store(dotp, b, inv_wn, o_ref, *, top_k: int,
                              out_dim: int, padded_out_dim: int,
                              idx_bits: int):
    """Given dense f32 dot products (TN, O_pad), route + store masked output."""
    full = dotp + b                          # dense logits x @ W.T + b
    # Routing score: same per-row ranking as cosine similarity
    # normalize(x) @ normalize(W).T (only the positive 1/||x|| factor dropped).
    score = dotp * inv_wn

    tn = score.shape[0]
    col = lax.broadcasted_iota(jnp.int32, (tn, padded_out_dim), 1)

    # Pack (score, column) into ONE sortable int32 key per element:
    #   high bits: order-preserving bitcast of the f32 score
    #   low  bits: bit-inverted column index (lowest column wins exact ties)
    raw = pltpu.bitcast(score, jnp.int32)
    key = jnp.where(raw >= 0, raw, raw ^ jnp.int32(0x7FFFFFFF))
    low_mask = (1 << idx_bits) - 1
    inv_col = jnp.maximum(jnp.int32(out_dim - 1) - col, 0)
    packed = (key & jnp.int32(~low_mask)) | inv_col
    neg = jnp.int32(jnp.iinfo(jnp.int32).min)
    if padded_out_dim != out_dim:            # mask zero-padded experts
        packed = jnp.where(col < out_dim, packed, neg)

    # Keys are unique per row, so we only need the k-th largest key.  k fully
    # unrolled pop-max steps: one XLU max-reduce + one compare/select pass
    # each (none on the last step), then a single >= threshold builds the
    # selection mask.  No per-step onehot / sel accumulation.
    packed_orig = packed
    kth = None
    for step in range(top_k):
        kth = jnp.max(packed, axis=-1, keepdims=True)            # (TN, 1)
        if step + 1 < top_k:
            packed = jnp.where(packed == kth, neg, packed)
    sel = packed_orig >= kth

    o_ref[...] = jnp.where(sel, full, 0.0).astype(o_ref.dtype)


def _routing_kernel(x_ref, wt_ref, b_ref, invw_ref, o_ref, *, top_k: int,
                    out_dim: int, padded_out_dim: int, idx_bits: int):
    """Resident-weight path: one MXU matmul per row tile."""
    dotp = jnp.dot(x_ref[...], wt_ref[...],
                   preferred_element_type=jnp.float32)           # (TN, O_pad)
    _routing_select_and_store(dotp, b_ref[...], invw_ref[...], o_ref,
                              top_k=top_k, out_dim=out_dim,
                              padded_out_dim=padded_out_dim, idx_bits=idx_bits)


def _routing_kernel_ksplit(x_ref, wt_ref, b_ref, invw_ref, o_ref, acc_ref, *,
                           top_k: int, out_dim: int, padded_out_dim: int,
                           idx_bits: int):
    """K-split path: contraction axis tiled on the grid, f32 VMEM accumulator."""
    k = pl.program_id(1)

    @pl.when(k == 0)
    def _():
        acc_ref[...] = jnp.zeros_like(acc_ref)

    acc_ref[...] += jnp.dot(x_ref[...], wt_ref[...],
                            preferred_element_type=jnp.float32)

    @pl.when(k == pl.num_programs(1) - 1)
    def _():
        _routing_select_and_store(acc_ref[...], b_ref[...], invw_ref[...],
                                  o_ref, top_k=top_k, out_dim=out_dim,
                                  padded_out_dim=padded_out_dim,
                                  idx_bits=idx_bits)


# ---------------------------------------------------------------------------
# Prepared weights (cache alongside the parameters; don't redo per forward)
# ---------------------------------------------------------------------------

class PreparedRoutingWeights(NamedTuple):
    wt: jax.Array        # (in_dim, padded_out_dim), native weight dtype
    inv_wn: jax.Array    # (1, padded_out_dim) f32, 1/||w_j|| (0 on padding)
    b: jax.Array         # (1, padded_out_dim) f32 bias (0 on padding)
    out_dim: int
    in_dim: int


def prepare_routing_weights(weight, bias=None) -> PreparedRoutingWeights:
    out_dim, in_dim = weight.shape
    o_pad = _round_up(out_dim, 128)          # lane-dense expert axis
    wt = jnp.transpose(weight)               # (in_dim, out_dim), native dtype
    w32 = weight.astype(jnp.float32)
    inv_wn = 1.0 / jnp.maximum(jnp.sqrt(jnp.sum(w32 * w32, axis=1)), 1e-12)
    b = (bias.astype(jnp.float32) if bias is not None
         else jnp.zeros((out_dim,), jnp.float32))
    if o_pad != out_dim:
        wt = jnp.pad(wt, ((0, 0), (0, o_pad - out_dim)))
        inv_wn = jnp.pad(inv_wn, (0, o_pad - out_dim))
        b = jnp.pad(b, (0, o_pad - out_dim))
    return PreparedRoutingWeights(wt, inv_wn.reshape(1, o_pad),
                                  b.reshape(1, o_pad), int(out_dim),
                                  int(in_dim))


# ---------------------------------------------------------------------------
# Forward wrapper
# ---------------------------------------------------------------------------

def fast_routing_linear(x, weight=None, bias=None, *, top_k: int = 32,
                        tile_n: int = 256, tile_k: Optional[int] = None,
                        out_dtype=None,
                        prepared: Optional[PreparedRoutingWeights] = None,
                        force_k_split: Optional[bool] = None):
    """Pallas forward of FastRoutingLinear.  x: (..., in_dim) -> (..., out_dim)."""
    if prepared is None:
        if weight is None:
            raise ValueError("either `weight` or `prepared` must be given")
        prepared = prepare_routing_weights(weight, bias)
    out_dim, in_dim = prepared.out_dim, prepared.in_dim
    o_pad = prepared.wt.shape[1]

    if x.shape[-1] != in_dim:
        raise ValueError(f"x last dim {x.shape[-1]} != in_dim {in_dim}")
    if not (1 <= top_k <= out_dim):
        raise ValueError(f"top_k={top_k} must be in [1, {out_dim}]")
    if out_dtype is None:
        out_dtype = x.dtype

    lead_shape = x.shape[:-1]
    x_flat = x.reshape(-1, in_dim)            # keep native dtype (no upcast)
    n = x_flat.shape[0]

    vmem_cap = _device_vmem_bytes()
    xb = jnp.dtype(x_flat.dtype).itemsize
    wb = jnp.dtype(prepared.wt.dtype).itemsize
    ob = jnp.dtype(out_dtype).itemsize

    # Row tile: multiple of 8 sublanes, default 256 (MXU-filling), but small
    # enough that the "parallel" grid axis has >= 2 steps so both v7x
    # TensorCores get work even for small batches.
    desired = max(8, (int(tile_n) // 8) * 8)
    half_rows = _round_up(-(-max(n, 1) // 2), 8)     # ceil(n/2) rounded to 8
    tile = max(8, min(desired, half_rows))

    # Weight residency: keep full W.T in VMEM (single-buffered) unless it eats
    # too much of the device budget, then split the contraction axis onto the
    # grid with an f32 accumulator so weight DMA pipelines against MXU work.
    weight_bytes = in_dim * o_pad * wb
    k_split = (weight_bytes > 0.45 * vmem_cap if force_k_split is None
               else bool(force_k_split))

    if k_split:
        tk = int(tile_k) if tile_k is not None else 512
        tk = max(128, (tk // 128) * 128)
        while tk > 128 and 2 * tk * o_pad * wb > 0.3 * vmem_cap:
            tk = max(128, (tk // 2 // 128) * 128)
        tk = min(tk, _round_up(in_dim, 128))
        in_pad = _round_up(in_dim, tk)
    else:
        tk = in_dim
        in_pad = in_dim

    def _vmem_est(t):
        io = 2 * t * tk * xb + 2 * t * o_pad * ob          # x / out tiles
        w = 2 * tk * o_pad * wb if k_split else weight_bytes
        acc = t * o_pad * 4 if k_split else 0
        inter = 10 * t * o_pad * 4          # f32/int32 selection intermediates
        return io + w + acc + inter + 4 * 8 * o_pad * 4    # + bias / inv_wn

    # Shrink the row tile until the working set fits the device VMEM budget
    # (handles large out_dim on v7x's 64 MiB VMEM automatically).
    while tile > 8 and _vmem_est(tile) > int(0.8 * vmem_cap):
        tile = max(8, (tile // 2 // 8) * 8)

    n_pad = _round_up(n, tile)
    if n_pad != n or in_pad != in_dim:
        x_flat = jnp.pad(x_flat, ((0, n_pad - n), (0, in_pad - in_dim)))
    wt = prepared.wt
    if in_pad != in_dim:
        wt = jnp.pad(wt, ((0, in_pad - in_dim), (0, 0)))

    idx_bits = max(1, (out_dim - 1).bit_length())
    vmem_limit = int(min(max(_vmem_est(tile) + (2 << 20), 32 << 20),
                         int(0.9 * vmem_cap)))

    common = dict(top_k=int(top_k), out_dim=out_dim, padded_out_dim=o_pad,
                  idx_bits=idx_bits)
    resident = pl.Buffered(1)   # grid-invariant blocks: no double-buffering

    if not k_split:
        kernel = functools.partial(_routing_kernel, **common)
        grid_spec = pltpu.PrefetchScalarGridSpec(
            num_scalar_prefetch=0,
            grid=(n_pad // tile,),
            in_specs=[
                pl.BlockSpec((tile, in_pad), lambda i: (i, 0)),     # x tile
                pl.BlockSpec((in_pad, o_pad), lambda i: (0, 0),
                             pipeline_mode=resident),               # W.T
                pl.BlockSpec((1, o_pad), lambda i: (0, 0),
                             pipeline_mode=resident),               # bias
                pl.BlockSpec((1, o_pad), lambda i: (0, 0),
                             pipeline_mode=resident),               # 1/||w||
            ],
            out_specs=pl.BlockSpec((tile, o_pad), lambda i: (i, 0)),
        )
        dim_sem = ("parallel",)
    else:
        kernel = functools.partial(_routing_kernel_ksplit, **common)
        grid_spec = pltpu.PrefetchScalarGridSpec(
            num_scalar_prefetch=0,
            grid=(n_pad // tile, in_pad // tk),
            in_specs=[
                pl.BlockSpec((tile, tk), lambda i, k: (i, k)),      # x tile
                pl.BlockSpec((tk, o_pad), lambda i, k: (k, 0)),     # W.T tile
                pl.BlockSpec((1, o_pad), lambda i, k: (0, 0),
                             pipeline_mode=resident),               # bias
                pl.BlockSpec((1, o_pad), lambda i, k: (0, 0),
                             pipeline_mode=resident),               # 1/||w||
            ],
            out_specs=pl.BlockSpec((tile, o_pad), lambda i, k: (i, 0)),
            scratch_shapes=[pltpu.VMEM((tile, o_pad), jnp.float32)],
        )
        dim_sem = ("parallel", "arbitrary")

    out_flat = pl.pallas_call(
        kernel,
        out_shape=jax.ShapeDtypeStruct((n_pad, o_pad), out_dtype),
        grid_spec=grid_spec,
        compiler_params=pltpu.CompilerParams(
            dimension_semantics=dim_sem,
            vmem_limit_bytes=vmem_limit),
    )(x_flat, wt, prepared.b, prepared.inv_wn)

    return out_flat[:n, :out_dim].reshape(*lead_shape, out_dim)


# ---------------------------------------------------------------------------
# Pure-JAX reference (mirror of the PyTorch forward) and self-test
# ---------------------------------------------------------------------------

def _reference_forward(x, weight, bias, top_k):
    out_dim, in_dim = weight.shape
    lead_shape = x.shape[:-1]
    xf = x.reshape(-1, in_dim).astype(jnp.float32)
    xn = xf / jnp.maximum(jnp.linalg.norm(xf, axis=1, keepdims=True), 1e-12)
    wn = weight / jnp.maximum(jnp.linalg.norm(weight, axis=1, keepdims=True), 1e-12)
    logits = xn @ wn.T
    _, ids = lax.top_k(logits, top_k)
    w_topk = weight[ids]                                   # (N, k, D)
    local = jnp.sum(w_topk * xf[:, None, :], axis=-1)      # (N, k)
    if bias is not None:
        local = local + bias[ids]
    out = jnp.zeros((xf.shape[0], out_dim), jnp.float32)
    out = out.at[jnp.arange(xf.shape[0])[:, None], ids].set(local)
    return out.reshape(*lead_shape, out_dim)


if __name__ == "__main__":
    key = jax.random.PRNGKey(0)
    k_x, k_w, k_b, k_x2, k_w2, k_b2 = jax.random.split(key, 6)

    # --- Test 1: resident-weight path (prepared-weights API) ---------------
    batch, seq, in_dim, out_dim, top_k = 2, 8, 32, 64, 8
    x = jax.random.normal(k_x, (batch, seq, in_dim), dtype=jnp.float32)
    weight = jax.random.normal(k_w, (out_dim, in_dim), dtype=jnp.float32)
    bias = jax.random.normal(k_b, (out_dim,), dtype=jnp.float32)

    prepared = prepare_routing_weights(weight, bias)
    out = fast_routing_linear(x, top_k=top_k, prepared=prepared)
    out = jax.block_until_ready(out)
    ref = _reference_forward(x, weight, bias, top_k)
    assert out.shape == (batch, seq, out_dim), out.shape
    assert jnp.allclose(out, ref, atol=2e-4, rtol=2e-4), float(
        jnp.max(jnp.abs(out - ref)))

    # --- Test 2: forced K-split path (contraction grid + f32 accumulator) --
    in_dim2, out_dim2, top_k2 = 256, 64, 8
    x2 = jax.random.normal(k_x2, (batch, seq, in_dim2), dtype=jnp.float32)
    w2 = jax.random.normal(k_w2, (out_dim2, in_dim2), dtype=jnp.float32)
    b2 = jax.random.normal(k_b2, (out_dim2,), dtype=jnp.float32)

    out2 = fast_routing_linear(x2, w2, b2, top_k=top_k2, tile_k=128,
                               force_k_split=True)
    out2 = jax.block_until_ready(out2)
    ref2 = _reference_forward(x2, w2, b2, top_k2)
    assert out2.shape == (batch, seq, out_dim2), out2.shape
    assert jnp.allclose(out2, ref2, atol=2e-4, rtol=2e-4), float(
        jnp.max(jnp.abs(out2 - ref2)))

    print("KERNEL_OK")
</pallas_src>

<mosaic_0001>
module attributes {stable_mosaic.version = 11 : i64} {
  func.func @_routing_kernel(%arg0: i32, %arg1: memref<8x32xf32, #tpu.memory_space<vmem>>, %arg2: memref<32x128xf32, #tpu.memory_space<vmem>>, %arg3: memref<1x128xf32, #tpu.memory_space<vmem>>, %arg4: memref<1x128xf32, #tpu.memory_space<vmem>>, %arg5: memref<8x128xf32, #tpu.memory_space<vmem>>) attributes {dimension_semantics = [#tpu.dimension_semantics<parallel>], iteration_bounds = array<i64: 2>, scalar_prefetch = 0 : i64, scratch_operands = 0 : i64, tpu.core_type = #tpu.core_type<tc>, window_params = [{transform_indices = @transform_0, window_bounds = array<i64: 8, 32>}, {pipeline_mode = #tpu.pipeline_mode<synchronous>, transform_indices = @transform_1, window_bounds = array<i64: 32, 128>}, {pipeline_mode = #tpu.pipeline_mode<synchronous>, transform_indices = @transform_2, window_bounds = array<i64: 1, 128>}, {pipeline_mode = #tpu.pipeline_mode<synchronous>, transform_indices = @transform_3, window_bounds = array<i64: 1, 128>}, {transform_indices = @transform_4, window_bounds = array<i64: 8, 128>}]} {
    %c0 = arith.constant 0 : index
    %c0_0 = arith.constant 0 : index
    %0 = vector.load %arg1[%c0, %c0_0] : memref<8x32xf32, #tpu.memory_space<vmem>>, vector<8x32xf32>
    %c0_1 = arith.constant 0 : index
    %c0_2 = arith.constant 0 : index
    %1 = vector.load %arg2[%c0_1, %c0_2] : memref<32x128xf32, #tpu.memory_space<vmem>>, vector<32x128xf32>
    %cst = arith.constant dense<0.000000e+00> : vector<8x128xf32>
    %2 = tpu.matmul %0, %1, %cst {dimension_numbers = #tpu.dot_dimension_numbers<[1], [0], [0], [1], [0, 0, 1, 1], [], []>} : vector<8x32xf32>, vector<32x128xf32>, vector<8x128xf32> -> vector<8x128xf32>
    %c0_3 = arith.constant 0 : index
    %c0_4 = arith.constant 0 : index
    %3 = vector.load %arg3[%c0_3, %c0_4] : memref<1x128xf32, #tpu.memory_space<vmem>>, vector<1x128xf32>
    %c0_5 = arith.constant 0 : index
    %c0_6 = arith.constant 0 : index
    %4 = vector.load %arg4[%c0_5, %c0_6] : memref<1x128xf32, #tpu.memory_space<vmem>>, vector<1x128xf32>
    %5 = vector.broadcast %3 : vector<1x128xf32> to vector<8x128xf32>
    %6 = arith.addf %2, %5 : vector<8x128xf32>
    %7 = vector.broadcast %4 : vector<1x128xf32> to vector<8x128xf32>
    %8 = arith.mulf %2, %7 : vector<8x128xf32>
    %9 = tpu.iota {dimensions = array<i32: 1>} : vector<8x128xi32>
    %10 = tpu.bitcast %8 : vector<8x128xf32> -> vector<8x128xi32>
    %c0_i32 = arith.constant 0 : i32
    %11 = vector.broadcast %c0_i32 : i32 to vector<8x128xi32>
    %12 = arith.cmpi sge, %10, %11 : vector<8x128xi32>
    %c2147483647_i32 = arith.constant 2147483647 : i32
    %13 = vector.broadcast %c2147483647_i32 : i32 to vector<8x128xi32>
    %14 = arith.xori %10, %13 : vector<8x128xi32>
    %15 = arith.select %12, %10, %14 : vector<8x128xi1>, vector<8x128xi32>
    %c63_i32 = arith.constant 63 : i32
    %16 = vector.broadcast %c63_i32 : i32 to vector<8x128xi32>
    %17 = arith.subi %16, %9 : vector<8x128xi32>
    %c0_i32_7 = arith.constant 0 : i32
    %18 = vector.broadcast %c0_i32_7 : i32 to vector<8x128xi32>
    %19 = arith.maxsi %17, %18 : vector<8x128xi32>
    %c-64_i32 = arith.constant -64 : i32
    %20 = vector.broadcast %c-64_i32 : i32 to vector<8x128xi32>
    %21 = arith.andi %15, %20 : vector<8x128xi32>
    %22 = arith.ori %21, %19 : vector<8x128xi32>
    %c64_i32 = arith.constant 64 : i32
    %23 = vector.broadcast %c64_i32 : i32 to vector<8x128xi32>
    %24 = arith.cmpi slt, %9, %23 : vector<8x128xi32>
    %c-2147483648_i32 = arith.constant -2147483648 : i32
    %25 = vector.broadcast %c-2147483648_i32 : i32 to vector<8x128xi32>
    %26 = arith.select %24, %22, %25 : vector<8x128xi1>, vector<8x128xi32>
    %cst_8 = arith.constant dense<-2147483648> : vector<8xi32>
    %27 = vector.multi_reduction <maxsi>, %26, %cst_8 [1] : vector<8x128xi32> to vector<8xi32>
    %28 = vector.shape_cast %27 : vector<8xi32> to vector<8x1xi32>
    %29 = vector.broadcast %28 : vector<8x1xi32> to vector<8x128xi32>
    %30 = arith.cmpi eq, %26, %29 : vector<8x128xi32>
    %c-2147483648_i32_9 = arith.constant -2147483648 : i32
    %31 = vector.broadcast %c-2147483648_i32_9 : i32 to vector<8x128xi32>
    %32 = arith.select %30, %31, %26 : vector<8x128xi1>, vector<8x128xi32>
    %cst_10 = arith.constant dense<-2147483648> : vector<8xi32>
    %33 = vector.multi_reduction <maxsi>, %32, %cst_10 [1] : vector<8x128xi32> to vector<8xi32>
    %34 = vector.shape_cast %33 : vector<8xi32> to vector<8x1xi32>
    %35 = vector.broadcast %34 : vector<8x1xi32> to vector<8x128xi32>
    %36 = arith.cmpi eq, %32, %35 : vector<8x128xi32>
    %c-2147483648_i32_11 = arith.constant -2147483648 : i32
    %37 = vector.broadcast %c-2147483648_i32_11 : i32 to vector<8x128xi32>
    %38 = arith.select %36, %37, %32 : vector<8x128xi1>, vector<8x128xi32>
    %cst_12 = arith.constant dense<-2147483648> : vector<8xi32>
    %39 = vector.multi_reduction <maxsi>, %38, %cst_12 [1] : vector<8x128xi32> to vector<8xi32>
    %40 = vector.shape_cast %39 : vector<8xi32> to vector<8x1xi32>
    %41 = vector.broadcast %40 : vector<8x1xi32> to vector<8x128xi32>
    %42 = arith.cmpi eq, %38, %41 : vector<8x128xi32>
    %c-2147483648_i32_13 = arith.constant -2147483648 : i32
    %43 = vector.broadcast %c-2147483648_i32_13 : i32 to vector<8x128xi32>
    %44 = arith.select %42, %43, %38 : vector<8x128xi1>, vector<8x128xi32>
    %cst_14 = arith.constant dense<-2147483648> : vector<8xi32>
    %45 = vector.multi_reduction <maxsi>, %44, %cst_14 [1] : vector<8x128xi32> to vector<8xi32>
    %46 = vector.shape_cast %45 : vector<8xi32> to vector<8x1xi32>
    %47 = vector.broadcast %46 : vector<8x1xi32> to vector<8x128xi32>
    %48 = arith.cmpi eq, %44, %47 : vector<8x128xi32>
    %c-2147483648_i32_15 = arith.constant -2147483648 : i32
    %49 = vector.broadcast %c-2147483648_i32_15 : i32 to vector<8x128xi32>
    %50 = arith.select %48, %49, %44 : vector<8x128xi1>, vector<8x128xi32>
    %cst_16 = arith.constant dense<-2147483648> : vector<8xi32>
    %51 = vector.multi_reduction <maxsi>, %50, %cst_16 [1] : vector<8x128xi32> to vector<8xi32>
    %52 = vector.shape_cast %51 : vector<8xi32> to vector<8x1xi32>
    %53 = vector.broadcast %52 : vector<8x1xi32> to vector<8x128xi32>
    %54 = arith.cmpi eq, %50, %53 : vector<8x128xi32>
    %c-2147483648_i32_17 = arith.constant -2147483648 : i32
    %55 = vector.broadcast %c-2147483648_i32_17 : i32 to vector<8x128xi32>
    %56 = arith.select %54, %55, %50 : vector<8x128xi1>, vector<8x128xi32>
    %cst_18 = arith.constant dense<-2147483648> : vector<8xi32>
    %57 = vector.multi_reduction <maxsi>, %56, %cst_18 [1] : vector<8x128xi32> to vector<8xi32>
    %58 = vector.shape_cast %57 : vector<8xi32> to vector<8x1xi32>
    %59 = vector.broadcast %58 : vector<8x1xi32> to vector<8x128xi32>
    %60 = arith.cmpi eq, %56, %59 : vector<8x128xi32>
    %c-2147483648_i32_19 = arith.constant -2147483648 : i32
    %61 = vector.broadcast %c-2147483648_i32_19 : i32 to vector<8x128xi32>
    %62 = arith.select %60, %61, %56 : vector<8x128xi1>, vector<8x128xi32>
    %cst_20 = arith.constant dense<-2147483648> : vector<8xi32>
    %63 = vector.multi_reduction <maxsi>, %62, %cst_20 [1] : vector<8x128xi32> to vector<8xi32>
    %64 = vector.shape_cast %63 : vector<8xi32> to vector<8x1xi32>
    %65 = vector.broadcast %64 : vector<8x1xi32> to vector<8x128xi32>
    %66 = arith.cmpi eq, %62, %65 : vector<8x128xi32>
    %c-2147483648_i32_21 = arith.constant -2147483648 : i32
    %67 = vector.broadcast %c-2147483648_i32_21 : i32 to vector<8x128xi32>
    %68 = arith.select %66, %67, %62 : vector<8x128xi1>, vector<8x128xi32>
    %cst_22 = arith.constant dense<-2147483648> : vector<8xi32>
    %69 = vector.multi_reduction <maxsi>, %68, %cst_22 [1] : vector<8x128xi32> to vector<8xi32>
    %70 = vector.shape_cast %69 : vector<8xi32> to vector<8x1xi32>
    %71 = vector.broadcast %70 : vector<8x1xi32> to vector<8x128xi32>
    %72 = arith.cmpi sge, %26, %71 : vector<8x128xi32>
    %cst_23 = arith.constant 0.000000e+00 : f32
    %73 = vector.broadcast %cst_23 : f32 to vector<8x128xf32>
    %74 = arith.select %72, %6, %73 : vector<8x128xi1>, vector<8x128xf32>
    %c0_24 = arith.constant 0 : index
    %c0_25 = arith.constant 0 : index
    %75 = vector.load %arg5[%c0_24, %c0_25] : memref<8x128xf32, #tpu.memory_space<vmem>>, vector<8x128xf32>
    tpu.vector_store %arg5[%c0_24, %c0_25], %74 {strides = array<i32>} : memref<8x128xf32, #tpu.memory_space<vmem>>, vector<8x128xf32>,
    return
  }
  func.func @transform_0(%arg0: i32) -> (i32, i32) {
    %c0_i32 = arith.constant 0 : i32
    %c0_i32_0 = arith.constant 0 : i32
    return %arg0, %c0_i32 : i32, i32
  }
  func.func @transform_1(%arg0: i32) -> (i32, i32) {
    %c0_i32 = arith.constant 0 : i32
    %c0_i32_0 = arith.constant 0 : i32
    %c0_i32_1 = arith.constant 0 : i32
    return %c0_i32, %c0_i32_0 : i32, i32
  }
  func.func @transform_2(%arg0: i32) -> (i32, i32) {
    %c0_i32 = arith.constant 0 : i32
    %c0_i32_0 = arith.constant 0 : i32
    %c0_i32_1 = arith.constant 0 : i32
    return %c0_i32, %c0_i32_0 : i32, i32
  }
  func.func @transform_3(%arg0: i32) -> (i32, i32) {
    %c0_i32 = arith.constant 0 : i32
    %c0_i32_0 = arith.constant 0 : i32
    %c0_i32_1 = arith.constant 0 : i32
    return %c0_i32, %c0_i32_0 : i32, i32
  }
  func.func @transform_4(%arg0: i32) -> (i32, i32) {
    %c0_i32 = arith.constant 0 : i32
    %c0_i32_0 = arith.constant 0 : i32
    return %arg0, %c0_i32 : i32, i32
  }
}

</mosaic_0001>

<bundles_post_ra>
// kernel: tpu_custom_call.1
= control target key start
LH: loop header
LB: loop body
LE: loop exit
PB: predicated region body
PF: predicated region fallthrough
CT: control target
= control target key end

     0   :  { %9 = vsyncpa [#allocation3], 0  ;;  %s1040_s0 = inlined_call_operand.hbm [shape: f32[16,32], index: 0, kind: input, shape index: {}]   ;;  %s1041_s1 = inlined_call_operand.hbm [shape: f32[32,128], index: 1, kind: input, shape index: {}]   ;;  %s1042_s2 = inlined_call_operand.vmem [shape: f32[1,128], index: 2, kind: input, shape index: {}]   ;;  %s1043_s3 = inlined_call_operand.vmem [shape: f32[1,128], index: 3, kind: input, shape index: {}]   ;;  %s1044_s4 = inlined_call_operand.hbm [shape: f32[16,128], index: 4, kind: output, shape index: {}]  }
   0x1   :  { %11 = vsyncpa [#allocation3 + $0x1], 0 }
   0x2   :  { %12 = vsyncpa [#allocation6], 0 }
   0x3   :  { %13 = vsyncpa [#allocation4], 0 }
   0x4   :  { %15 = vsyncpa [#allocation4 + $0x1], 0  ;;  %s823_s15 = smov 0   ;;  %s825_s16 = smov 0  }
   0x5   :  { %s827_s17 = smov 0   ;;  %s829_s18 = smov 0  }
   0x6 LB: > { %s844_s19 = sadd.s32 4294967295, %s788_s18   ;;  %s559_s20 = sadd.s32 4294967294, %s788_s18   ;;  %s788_s18 = sphi %s829_s18, %s1064_s18   ;;  %s784_s17 = sphi %s827_s17, %s1063_s17   ;;  %s780_s16 = sphi %s825_s16, %s1062_s16   ;;  %s776_s15 = sphi %s823_s15, %s1061_s15  }
   0x7   : > { %p41_p0 = scmp.ne.s32.totalorder %s780_s16, %s776_s15  ;;  %p1045_p1 = scmp.eq.s32.totalorder %s844_s19, 0 }
   0x8   : > { %p134_p3 = scmp.eq.s32.totalorder %s559_s20, 1  ;;  %p560_p5 = scmp.ge.s32.totalorder %s788_s18, 1 }
   0x9   : > { %p853_p4 = por %p1045_p1, %p41_p0  ;;  %p141_p7 = scmp.lt.s32.totalorder %s788_s18, 3 }
   0xa   : > { %p858_p6 = por %p134_p3, %p41_p0  ;;  %s790_s24 = smov [#allocation5]  }
   0xb   : > { %s1048_s21 = scalar_select %p853_p4, 1, 0 }
   0xc   : > { %s1049_s22 = scalar_select %p858_p6, 1, 0 }
   0xd   : > { %p863_p8 = pnand %p560_p5, %p141_p7  ;;  %s153_s25 = sshll.u32 %s790_s24, 4  ;;  %s867_s25 = int_to_ptr.vmem [resolvable:$true] %s153_s25 }
   0xe   : > { %s879_s27 = sadd.s32 1, %s788_s18   ;;  %s28_s28 = sadd.s32 1, %s784_s17 }
   0xf   : > { %s1050_s23 = scalar_select %p863_p8, 1, 0 }
  0x10   : > { %p606_p9 = pneg %p863_p8  ;;  %s25_s29 = ssub.s32 %s788_s18, %s879_s27 }
  0x11   : > { %s660_s6 = scalar_lea.hbm %s1041_s1, 512 }
  0x12   : > { %p874_p11 = pnand %p606_p9, %p1045_p1  ;;  %p661_p12 = scmp.ne.s32.totalorder %s1041_s1, %s660_s6 }
  0x13   : > { %p667_p5 = scmp.lt.u32.totalorder %s660_s6, %s1041_s1 }
  0x14   : > { %p662_p13 = pneg %p874_p11 }
  0x16   : > { %p663_p0 = pnand %p662_p13, %p661_p12 }
  0x18   : > { %p664_p3 = pneg %p663_p0 }
  0x1a   : > { %p669_p7 = pnand %p667_p5, %p664_p3 }
  0x1c   : > { %672 = shalt.err (!%p669_p7)
}
  0x1d   : > { %s673_s11 = scalar_lea.vmem %s867_s25, 512  ;;  %p681_p2 = scmp.lt.s32.totalorder %s867_s25, %s867_s25 }
  0x1e   : > { %p674_p9 = scmp.ne.s32.totalorder %s867_s25, %s673_s11  ;;  %p682_p6 = scmp.lt.s32.totalorder %s673_s11, %s673_s11 }
  0x20   : > { %p676_p10 = pnand %p674_p9, %p662_p13  ;;  %p683_p4 = por %p682_p6, %p681_p2 }
  0x22   : > { %p677_p1 = pneg %p676_p10 }
  0x24   : > { %p684_p8 = pnand %p683_p4, %p677_p1 }
  0x26   : > { %687 = shalt.err (!%p684_p8)
}
  0x27   : > { %s791_s12 = smov 128   ;;  %s792_s13 = smov 8  }
  0x28   : > { %609 = dma.hbm_to_vmem [thread:$0]  (!%p874_p11), %s1041_s1, 512, %s867_s25, [#allocation6], %s791_s12, %s791_s12, %s792_s13  }
  0x29   : > { %p26_p2 = scmp.eq.s32.totalorder %s25_s29, 0  ;;  %p35_p1 = scmp.ne.s32.totalorder %s784_s17, %s780_s16 }
  0x2a   : > { %p36_p4 = scmp.eq.s32.totalorder %s788_s18, 0  ;;  %p619_p6 = scmp.lt.s32.totalorder %s788_s18, 2 }
  0x2b   : > { %s910_s24 = scalar_select %p26_p2, %s784_s17, %s28_s28  }
  0x2c   : > { %p37_p8 = por %p36_p4, %p35_p1  ;;  %p1052_p10 = scmp.eq.s32.totalorder %s844_s19, 1 }
  0x2d   : > { %s173_s5 = sand.u32 1, %s784_s17   ;;  %s564_s6 = sshll.u32 %s788_s18, 7 }
  0x2e   : > { %p914_p12 = por %p1052_p10, %p35_p1  ;;  %s563_s7 = sshll.u32 %s173_s5, 3 }
  0x2f   : > { %s923_s9 = scalar_lea.hbm %s1040_s0, %s564_s6  ;;  %s177_s25 = scalar_lea.vmem [#allocation2], %s563_s7 }
  0x30   : > { %s184_s28 = sshll.u32 %s177_s25, 4  ;;  %p925_p11 = pnand %p619_p6, %p37_p8  ;;  %s929_s28 = int_to_ptr.vmem [resolvable:$true] %s184_s28 }
  0x31   : > { %s174_s10 = scalar_lea.sflag [#allocation3], %s173_s5  ;;  %s688_s11 = scalar_lea.hbm %s923_s9, 128 }
  0x32   : > { %p689_p13 = scmp.ne.s32.totalorder %s923_s9, %s688_s11  ;;  %p690_p0 = pneg %p925_p11 }
  0x33   : > { %s693_s14 = scalar_lea.hbm %s1040_s0, 256  ;;  %p694_p7 = scmp.lt.u32.totalorder %s923_s9, %s1040_s0 }
  0x34   : > { %p691_p3 = pnand %p690_p0, %p689_p13  ;;  %p695_p9 = scmp.lt.u32.totalorder %s693_s14, %s688_s11 }
  0x35   : > { %p697_p1 = scmp.lt.u32.totalorder %s688_s11, %s923_s9 }
  0x36   : > { %p692_p5 = pneg %p691_p3  ;;  %p696_p2 = por %p695_p9, %p694_p7 }
  0x38   : > { %p698_p4 = por %p697_p1, %p696_p2 }
  0x3a   : > { %p699_p6 = pnand %p698_p4, %p692_p5 }
  0x3c   : > { %702 = shalt.err (!%p699_p6)
}
  0x3d   : > { %s703_s5 = scalar_lea.vmem %s929_s28, 128  ;;  %s793_s7 = smov [#allocation2]  }
  0x3e   : > { %p704_p8 = scmp.ne.s32.totalorder %s929_s28, %s703_s5  ;;  %s708_s26 = sshll.u32 %s793_s7, 4  ;;  %s709_s26 = int_to_ptr.vmem [resolvable:$false] %s708_s26 }
  0x3f   : > { %s710_s8 = scalar_lea.vmem %s709_s26, 256  ;;  %p711_p3 = scmp.lt.s32.totalorder %s929_s28, %s709_s26 }
  0x40   : > { %p706_p10 = pnand %p704_p8, %p690_p0  ;;  %p712_p7 = scmp.lt.s32.totalorder %s710_s8, %s703_s5 }
  0x42   : > { %p707_p13 = pneg %p706_p10  ;;  %p713_p9 = por %p712_p7, %p711_p3 }
  0x44   : > { %p714_p2 = pnand %p713_p9, %p707_p13 }
  0x46   : > { %717 = shalt.err (!%p714_p2)
}
  0x47   : > { %613 = dma.hbm_to_vmem [thread:$0]  (!%p925_p11), %s923_s9, 128, %s929_s28, %s174_s10  }
  0x48   : > { %p1055_p5 = scmp.ne.s32.totalorder %s1050_s23, 0 }
  0x49   : > { %s959_s25 = sand.u32 (!%p1055_p5), 1, %s780_s16   ;;  %p1056_p0 = scmp.ne.s32.totalorder (!%p1055_p5), %s1048_s21, 0 }
  0x4a   : > { %193 = sbr.rel (%p1055_p5) target bundleno = 2699 (0xa8b), region = 36  ;;  %s566_s11 = sshll.u32 (!%p1055_p5), %s959_s25, 3 }
  0x4b   : > { %s196_s12 = scalar_lea.sflag (!%p1055_p5), [#allocation3], %s959_s25  ;;  %s199_s13 = scalar_lea.vmem (!%p1055_p5), [#allocation2], %s566_s11 }
  0x51   : > { %763 = dma.done.wait (%p1056_p0), %s196_s12, 128  }
  0x52   : > { %765 = vsyncadd (%p1056_p0), %s196_s12, 4294967168  ;;  %p1057_p11 = scmp.eq.s32.totalorder %s844_s19, 0 }
  0x54   : > { %767 = dma.done.wait (%p1057_p11), [#allocation6], 512   ;;  %p1058_p1 = pmov %p1057_p11 }
  0x55   : > { %v794_v0 = vmov 0.0|0.0   ;;  %vm795_vm0 = vmmov 0   ;;  %v796_v1 = vmov 0.0   ;;  %v229_v2 = vld [vmem:[#allocation5] sm:$0xff]  ;;  %v230_v3 = vld [vmem:[#allocation5 + $0x8] sm:$0xff]  ;;  %v231_v4 = vld [vmem:[#allocation5 + $0x10] sm:$0xff]  ;;  %v323_v9 = vlaneseq }
  0x56   : > { %769 = vsyncadd (%p1058_p1), [#allocation6], 4294966784  ;;  %592 = vmatprep.subr.bf16.mxu0 %v794_v0  ;;  %589 = vmatprep.mubr.msk.f32.mxu0 %vm795_vm0, %v796_v1  ;;  %v593_v5 = vpack.c.bf16 %v230_v3, %v229_v2  ;;  %v232_v6 = vld [vmem:[#allocation5 + $0x18] sm:$0xff]  ;;  %vm233_vm1 = vcmask 261120   ;;  %v571_v11 = vld [vmem:[%s1043_s3] ss:$0 sm:$0xff] }
  0x57   : > { %v596_v7 = vpack.c.bf16 %v232_v6, %v231_v4  ;;  %v228_v8 = vld [vmem:[%s199_s13] sm:$0xff]  ;;  %v324_v10 = vand.u32 127, %v323_v9  ;;  %s573_s29 = sshll.u32 %s844_s19, 7  ;;  %s227_s10 = scalar_lea.vmem [#allocation7], %s566_s11 }
  0x58   : > { %594 = vmatpush3.bf16.msra.mxu0 %v593_v5  ;;  %s479_s14 = sshll.u32 %s227_s10, 4  ;;  %s996_s5 = scalar_lea.hbm %s1044_s4, %s573_s29  ;;  %s998_s14 = int_to_ptr.vmem [resolvable:$true] %s479_s14 }
  0x59   : > { %595 = vmatprep.subr.bf16.mxu0 %v794_v0  ;;  %v329_v12 = vsub.s32 63, %v324_v10  ;;  %vm334_vm4 = vcmp.lt.s32.totalorder %v324_v10, 64  ;;  %s466_s19 = scalar_lea.sflag [#allocation4], %s959_s25  ;;  %s718_s7 = scalar_lea.vmem %s998_s14, 128 }
  0x5a   : > { %p719_p4 = scmp.ne.s32.totalorder %s998_s14, %s718_s7  ;;  %s797_s26 = smov [#allocation7]  }
  0x5b   : > { %vm330_vm2 = vcmp.gt.s32.totalorder %v329_v12, 0  ;;  %s722_s8 = sshll.u32 %s797_s26, 4  ;;  %s723_s8 = int_to_ptr.vmem [resolvable:$false] %s722_s8 }
  0x5c   : > { %597 = vmatpush3.bf16.msra.mxu0 %v596_v7  ;;  %v331_v18 = vsel %vm330_vm2, %v329_v12, 0  ;;  %p720_p6 = pnand %p719_p4, %p914_p12  ;;  %s724_s11 = scalar_lea.vmem %s723_s8, 256 }
  0x5d   : > { %p725_p10 = scmp.lt.s32.totalorder %s998_s14, %s723_s8  ;;  %p726_p13 = scmp.lt.s32.totalorder %s724_s11, %s718_s7 }
  0x5e   : > { %p721_p8 = pneg %p720_p6 }
  0x5f   : > { %590 = vmatmul.mubr.msk.f32.vlgmr.msra.gmra.mrb[0].mxu0 %vm233_vm1, %v228_v8  ;;  %p727_p3 = por %p726_p13, %p725_p10 }
  0x61   : > { %p728_p7 = pnand %p727_p3, %p721_p8 }
 0x132   : > { %v976_v13 = vpop.f32.mrb[0].mxu0 }
 0x133   : > { %v322_v14 = vmul.f32 %v571_v11, %v976_v13  ;;  %v591_v15 = vpop.f32.mrb[1].mxu0 }
 0x135   : > { %vm326_vm3 = vcmp.ge.s32.totalorder %v322_v14, 0  ;;  %v327_v16 = vxor.u32 2147483647, %v322_v14 }
 0x137   : > { %v328_v17 = vsel %vm326_vm3, %v322_v14, %v327_v16 }
 0x138   : > { %v332_v19 = vand.u32 4294967232, %v328_v17 }
 0x13a   : > { %v333_v20 = vor.u32 %v332_v19, %v331_v18 }
 0x13c   : > { %v979_v21 = vsel %vm334_vm4, %v333_v20, 2147483648 }
 0x13d   : > { %v337_v22 = vshra.s32 %v979_v21, 16  ;;  %v336_v24 = vand.u32 65535, %v979_v21 }
 0x13f   : > { %v339_v23 = vcvt.s32.f32 %v337_v22  ;;  %v338_v26 = vcvt.s32.f32 %v336_v24 }
 0x141   : > { %340 = vmax.xlane.f32.xlu0 %v339_v23 }
 0x1ce   : > { %v341_v25 = vpop.xlane.xlu0 %340 }
 0x1cf   : > { %vm342_vm5 = vcmp.eq.f32.partialorder %v339_v23, %v341_v25  ;;  %v347_v28 = vcvt.f32.s32 %v341_v25 }
 0x1d0   : > { %v343_v27 = vsel %vm342_vm5, %v338_v26, -inf }
 0x1d1   : > { %344 = vmax.xlane.f32.xlu0 %v343_v27  ;;  %v348_v30 = vshll.u32 %v347_v28, 16 }
 0x25e   : > { %v345_v29 = vpop.xlane.xlu0 %344 }
 0x25f   : > { %v346_v31 = vcvt.f32.s32 %v345_v29 }
 0x261   : > { %v349_v32 = vadd.s32 %v348_v30, %v346_v31 }
 0x263   : > { %vm350_vm6 = vcmp.eq.s32.totalorder %v979_v21, %v349_v32 }
 0x264   : > { %v351_v33 = vsel %vm350_vm6, 2147483648, %v979_v21 }
 0x265   : > { %v353_v34 = vshra.s32 %v351_v33, 16  ;;  %v352_v36 = vand.u32 65535, %v351_v33 }
 0x267   : > { %v355_v35 = vcvt.s32.f32 %v353_v34  ;;  %v354_v38 = vcvt.s32.f32 %v352_v36 }
 0x269   : > { %356 = vmax.xlane.f32.xlu1 %v355_v35 }
 0x2f6   : > { %v357_v37 = vpop.xlane.xlu1 %356 }
 0x2f7   : > { %vm358_vm7 = vcmp.eq.f32.partialorder %v355_v35, %v357_v37  ;;  %v363_v40 = vcvt.f32.s32 %v357_v37 }
 0x2f8   : > { %v359_v39 = vsel %vm358_vm7, %v354_v38, -inf }
 0x2f9   : > { %360 = vmax.xlane.f32.xlu1 %v359_v39  ;;  %v364_v42 = vshll.u32 %v363_v40, 16 }
 0x386   : > { %v361_v41 = vpop.xlane.xlu1 %360 }
 0x387   : > { %v362_v43 = vcvt.f32.s32 %v361_v41 }
 0x389   : > { %v365_v44 = vadd.s32 %v364_v42, %v362_v43 }
 0x38b   : > { %vm366_vm8 = vcmp.eq.s32.totalorder %v351_v33, %v365_v44 }
 0x38c   : > { %v367_v45 = vsel %vm366_vm8, 2147483648, %v351_v33 }
 0x38d   : > { %v369_v46 = vshra.s32 %v367_v45, 16  ;;  %v368_v48 = vand.u32 65535, %v367_v45 }
 0x38f   : > { %v371_v47 = vcvt.s32.f32 %v369_v46  ;;  %v370_v50 = vcvt.s32.f32 %v368_v48 }
 0x391   : > { %372 = vmax.xlane.f32.xlu0 %v371_v47 }
 0x41e   : > { %v373_v49 = vpop.xlane.xlu0 %372 }
 0x41f   : > { %vm374_vm9 = vcmp.eq.f32.partialorder %v371_v47, %v373_v49  ;;  %v379_v52 = vcvt.f32.s32 %v373_v49 }
 0x420   : > { %v375_v51 = vsel %vm374_vm9, %v370_v50, -inf }
 0x421   : > { %376 = vmax.xlane.f32.xlu1 %v375_v51  ;;  %v380_v54 = vshll.u32 %v379_v52, 16  ;;  %v570_v52 = vld [vmem:[%s1042_s2] ss:$0 sm:$0xff] }
 0x4ae   : > { %v377_v53 = vpop.xlane.xlu1 %376 }
 0x4af   : > { %v378_v55 = vcvt.f32.s32 %v377_v53 }
 0x4b1   : > { %v381_v56 = vadd.s32 %v380_v54, %v378_v55 }
 0x4b3   : > { %vm382_vm10 = vcmp.eq.s32.totalorder %v367_v45, %v381_v56  ;;  %v315_v56 = vadd.f32 %v570_v52, %v976_v13 }
 0x4b4   : > { %v383_v57 = vsel %vm382_vm10, 2147483648, %v367_v45 }
 0x4b5   : > { %v385_v58 = vshra.s32 %v383_v57, 16  ;;  %v384_v60 = vand.u32 65535, %v383_v57 }
 0x4b7   : > { %v387_v59 = vcvt.s32.f32 %v385_v58  ;;  %v386_v62 = vcvt.s32.f32 %v384_v60 }
 0x4b9   : > { %388 = vmax.xlane.f32.xlu0 %v387_v59 }
 0x546   : > { %v389_v61 = vpop.xlane.xlu0 %388 }
 0x547   : > { %vm390_vm11 = vcmp.eq.f32.partialorder %v387_v59, %v389_v61  ;;  %v395_v0 = vcvt.f32.s32 %v389_v61 }
 0x548   : > { %v391_v63 = vsel %vm390_vm11, %v386_v62, -inf }
 0x549   : > { %392 = vmax.xlane.f32.xlu1 %v391_v63  ;;  %v396_v2 = vshll.u32 %v395_v0, 16 }
 0x5d6   : > { %v393_v1 = vpop.xlane.xlu1 %392 }
 0x5d7   : > { %v394_v3 = vcvt.f32.s32 %v393_v1 }
 0x5d9   : > { %v397_v4 = vadd.s32 %v396_v2, %v394_v3 }
 0x5db   : > { %vm398_vm12 = vcmp.eq.s32.totalorder %v383_v57, %v397_v4 }
 0x5dc   : > { %v399_v5 = vsel %vm398_vm12, 2147483648, %v383_v57 }
 0x5dd   : > { %v401_v6 = vshra.s32 %v399_v5, 16  ;;  %v400_v8 = vand.u32 65535, %v399_v5 }
 0x5df   : > { %v403_v7 = vcvt.s32.f32 %v401_v6  ;;  %v402_v10 = vcvt.s32.f32 %v400_v8 }
 0x5e1   : > { %404 = vmax.xlane.f32.xlu0 %v403_v7 }
 0x66e   : > { %v405_v9 = vpop.xlane.xlu0 %404 }
 0x66f   : > { %vm406_vm13 = vcmp.eq.f32.partialorder %v403_v7, %v405_v9  ;;  %v411_v12 = vcvt.f32.s32 %v405_v9 }
 0x670   : > { %v407_v11 = vsel %vm406_vm13, %v402_v10, -inf }
 0x671   : > { %408 = vmax.xlane.f32.xlu1 %v407_v11  ;;  %v412_v15 = vshll.u32 %v411_v12, 16 }
 0x6fe   : > { %v409_v14 = vpop.xlane.xlu1 %408 }
 0x6ff   : > { %v410_v16 = vcvt.f32.s32 %v409_v14 }
 0x701   : > { %v413_v17 = vadd.s32 %v412_v15, %v410_v16 }
 0x703   : > { %vm414_vm14 = vcmp.eq.s32.totalorder %v399_v5, %v413_v17 }
 0x704   : > { %v415_v18 = vsel %vm414_vm14, 2147483648, %v399_v5 }
 0x705   : > { %v417_v19 = vshra.s32 %v415_v18, 16  ;;  %v416_v22 = vand.u32 65535, %v415_v18 }
 0x707   : > { %v419_v20 = vcvt.s32.f32 %v417_v19  ;;  %v418_v24 = vcvt.s32.f32 %v416_v22 }
 0x709   : > { %420 = vmax.xlane.f32.xlu0 %v419_v20 }
 0x796   : > { %v421_v23 = vpop.xlane.xlu0 %420 }
 0x797   : > { %vm422_vm15 = vcmp.eq.f32.partialorder %v419_v20, %v421_v23  ;;  %v427_v26 = vcvt.f32.s32 %v421_v23 }
 0x798   : > { %v423_v25 = vsel %vm422_vm15, %v418_v24, -inf }
 0x799   : > { %424 = vmax.xlane.f32.xlu1 %v423_v25  ;;  %v428_v28 = vshll.u32 %v427_v26, 16 }
 0x826   : > { %v425_v27 = vpop.xlane.xlu1 %424 }
 0x827   : > { %v426_v29 = vcvt.f32.s32 %v425_v27 }
 0x829   : > { %v429_v30 = vadd.s32 %v428_v28, %v426_v29 }
 0x82b   : > { %vm430_vm0 = vcmp.eq.s32.totalorder %v415_v18, %v429_v30 }
 0x82c   : > { %v431_v31 = vsel %vm430_vm0, 2147483648, %v415_v18 }
 0x82d   : > { %v433_v32 = vshra.s32 %v431_v31, 16  ;;  %v432_v34 = vand.u32 65535, %v431_v31 }
 0x82f   : > { %v435_v33 = vcvt.s32.f32 %v433_v32  ;;  %v434_v36 = vcvt.s32.f32 %v432_v34 }
 0x831   : > { %436 = vmax.xlane.f32.xlu0 %v435_v33 }
 0x8be   : > { %v437_v35 = vpop.xlane.xlu0 %436 }
 0x8bf   : > { %vm438_vm1 = vcmp.eq.f32.partialorder %v435_v33, %v437_v35  ;;  %v443_v38 = vcvt.f32.s32 %v437_v35 }
 0x8c0   : > { %v439_v37 = vsel %vm438_vm1, %v434_v36, -inf }
 0x8c1   : > { %440 = vmax.xlane.f32.xlu1 %v439_v37  ;;  %v444_v40 = vshll.u32 %v443_v38, 16 }
 0x94e   : > { %v441_v39 = vpop.xlane.xlu1 %440 }
 0x94f   : > { %v442_v41 = vcvt.f32.s32 %v441_v39 }
 0x951   : > { %v445_v42 = vadd.s32 %v444_v40, %v442_v41 }
 0x953   : > { %vm446_vm2 = vcmp.eq.s32.totalorder %v431_v31, %v445_v42 }
 0x954   : > { %v447_v43 = vsel %vm446_vm2, 2147483648, %v431_v31 }
 0x955   : > { %v449_v44 = vshra.s32 %v447_v43, 16  ;;  %v448_v46 = vand.u32 65535, %v447_v43 }
 0x957   : > { %v451_v45 = vcvt.s32.f32 %v449_v44  ;;  %v450_v48 = vcvt.s32.f32 %v448_v46 }
 0x959   : > { %452 = vmax.xlane.f32.xlu0 %v451_v45 }
 0x9e6   : > { %v453_v47 = vpop.xlane.xlu0 %452 }
 0x9e7   : > { %vm454_vm3 = vcmp.eq.f32.partialorder %v451_v45, %v453_v47  ;;  %v459_v50 = vcvt.f32.s32 %v453_v47 }
 0x9e8   : > { %v455_v49 = vsel %vm454_vm3, %v450_v48, -inf }
 0x9e9   : > { %456 = vmax.xlane.f32.xlu1 %v455_v49  ;;  %v460_v53 = vshll.u32 %v459_v50, 16 }
 0xa76   : > { %v457_v51 = vpop.xlane.xlu1 %456 }
 0xa77   : > { %v458_v54 = vcvt.f32.s32 %v457_v51 }
 0xa79   : > { %v461_v55 = vadd.s32 %v460_v53, %v458_v54 }
 0xa7b   : > { %vm462_vm4 = vcmp.ge.s32.totalorder %v979_v21, %v461_v55 }
 0xa7c   : > { %v463_v57 = vsel %vm462_vm4, %v315_v56, 0.0 }
 0xa7d   : > { %464 = vst [vmem:[%s227_s10] sm:$0xff] %v463_v57 }
 0xa7e   : > { %731 = shalt.err (!%p728_p7)
}
 0xa7f   : > { %s732_s25 = scalar_lea.hbm %s996_s5, 128  ;;  %s736_s21 = scalar_lea.hbm %s1044_s4, 256 }
 0xa80   : > { %p733_p9 = scmp.ne.s32.totalorder %s996_s5, %s732_s25  ;;  %p737_p0 = scmp.lt.u32.totalorder %s996_s5, %s1044_s4 }
 0xa81   : > { %p738_p11 = scmp.lt.u32.totalorder %s736_s21, %s732_s25  ;;  %p740_p4 = scmp.lt.u32.totalorder %s732_s25, %s996_s5 }
 0xa82   : > { %p734_p2 = pnand %p733_p9, %p914_p12 }
 0xa83   : > { %p739_p1 = por %p738_p11, %p737_p0 }
 0xa84   : > { %p735_p5 = pneg %p734_p2 }
 0xa85   : > { %p741_p6 = por %p740_p4, %p739_p1 }
 0xa87   : > { %p742_p8 = pnand %p741_p6, %p735_p5 }
 0xa89   : > { %745 = shalt.err (!%p742_p8)
}
 0xa8a   : > { %604 = dma.vmem_to_hbm [thread:$0]  (%p914_p12), %s998_s14, 128, %s996_s5, %s466_s19  }
 0xa8b PF: > { %s491_s28 = sand.u32 1, %s776_s15   ;;  %p1059_p10 = scmp.ne.s32.totalorder %s1049_s22, 0 }
 0xa8c   : > { %p1060_p13 = scmp.ge.s32.totalorder %s788_s18, 2  ;;  %s492_s29 = scalar_lea.sflag [#allocation4], %s491_s28 }
 0xa8e   : > { %p615_p3 = pnand %p1060_p13, %p1059_p10 }
 0xa90   : > { %771 = dma.done.wait (!%p615_p3), %s492_s29, 128  }
 0xa91   : > { %773 = vsyncadd (!%p615_p3), %s492_s29, 4294967168  ;;  %p18_p7 = scmp.ge.s32.totalorder %s879_s27, 4   ;;  %s1061_s15 = smov %s780_s16 }
 0xa92   : > { %s1062_s16 = smov %s784_s17  ;;  %s1063_s17 = smov %s910_s24 }
 0xa93   : > { %s1064_s18 = smov %s879_s27  ;;  %20 = sbr.rel (!%p18_p7) target bundleno = 6 (0x6), region = 85 }
 0xa9a   :  { %497 = vsyncpa [#allocation3], 1 }
 0xa9b   :  { %499 = vsyncpa [#allocation3 + $0x1], 1 }
 0xa9c   :  { %500 = vsyncpa [#allocation6], 1 }
 0xa9d   :  { %501 = vsyncpa [#allocation4], 1 }
 0xa9e   :  { %503 = vsyncpa [#allocation4 + $0x1], 1 }

</bundles_post_ra>
